<compile_context>
chip_gen: v6e
topology: v6e:2x2x1
jax: 0.10.0
libtpu: 0.0.40
codegen_flags: <defaults>
</compile_context>

<pallas_src>
import jax
import jax.numpy as jnp
from jax.experimental import pallas as pl
from jax.experimental.pallas import tpu as pltpu


# ---------------------------------------------------------------------------
# Pass 1: tiled global pooling — per-row sums of the folded (rows, LS) view.
# ---------------------------------------------------------------------------
def _pool_kernel(x_ref, sum_ref):
    # x_ref: (TR, LS) in the input dtype; accumulate the lane reduction in f32.
    sum_ref[...] = jnp.sum(x_ref[...], axis=1, keepdims=True, dtype=jnp.float32)


# ---------------------------------------------------------------------------
# Pass 2: broadcast channel-gate multiply (purely memory-bound).
# ---------------------------------------------------------------------------
def _scale_kernel(x_ref, g_ref, o_ref):
    # x_ref: (TR, LS), g_ref: (TR, 1) already cast to the input dtype.
    o_ref[...] = x_ref[...] * g_ref[...]


def _round_up(a, b):
    return ((a + b - 1) // b) * b


def _fold_layout(R, S, dtype, lane_tile, target_block_bytes):
    """Pick the lane-dense folded layout (rows, LS) and the row tile TR."""
    itemsize = jnp.dtype(dtype).itemsize
    sub = 8 * max(1, 4 // itemsize)               # sublane multiple: 8 f32, 16 bf16
    LS = min(lane_tile, _round_up(S, 128))        # lanes per folded row (mult of 128)
    Sp = _round_up(S, LS)                         # padded flattened-spatial extent
    G = Sp // LS                                  # folded rows per (batch, channel)
    rows = R * G
    tr = max(sub, (target_block_bytes // (LS * itemsize)) // sub * sub)
    if rows <= tr:
        TR, rows_p = rows, rows                   # single full-extent row block (legal)
    else:
        TR, rows_p = tr, _round_up(rows, tr)
    return LS, Sp, G, TR, rows_p


def attention_se_ca(x, w1, b1, w2, b2, *, lane_tile=512,
                    target_block_bytes=2 << 20, donate_input=False):
    """x: (N, C, D, H, W). w1, w2: (C, C) PyTorch Linear layout (out, in); b1, b2: (C,)."""
    N, C, D, H, W = x.shape
    S = D * H * W
    R = N * C
    dtype = x.dtype
    LS, Sp, G, TR, rows_p = _fold_layout(R, S, dtype, lane_tile, target_block_bytes)
    rows = R * G
    n_row_tiles = rows_p // TR

    # Lane-dense folded 2-D view. Pure bitcast when no padding is needed; zero padding
    # otherwise (zeros keep the pooled sums unbiased — we divide by the true S below).
    x2 = x.reshape(R, S)
    if Sp != S:
        x2 = jnp.pad(x2, ((0, 0), (0, Sp - S)))
    xf = x2.reshape(rows, LS)
    if rows_p != rows:
        xf = jnp.pad(xf, ((0, rows_p - rows), (0, 0)))

    # ---- Pass 1: tiled pooling (per folded-row sums in f32). ----
    row_sums = pl.pallas_call(
        _pool_kernel,
        out_shape=jax.ShapeDtypeStruct((rows_p, 1), jnp.float32),
        grid_spec=pltpu.PrefetchScalarGridSpec(
            num_scalar_prefetch=0,
            grid=(n_row_tiles,),
            in_specs=[pl.BlockSpec((TR, LS), lambda i: (i, 0))],
            out_specs=pl.BlockSpec((TR, 1), lambda i: (i, 0)),
        ),
        compiler_params=pltpu.CompilerParams(
            dimension_semantics=("parallel",),
        ),
    )(xf)

    # ---- Gate: two tiny (N,C)@(C,C) matmuls, once for all batches, in XLA / f32. ----
    means = row_sums[:rows, 0].reshape(R, G).sum(axis=1).reshape(N, C) / float(S)
    h = jnp.maximum(
        means @ jnp.asarray(w1, jnp.float32).T + jnp.asarray(b1, jnp.float32), 0.0)
    gate = jax.nn.sigmoid(
        h @ jnp.asarray(w2, jnp.float32).T + jnp.asarray(b2, jnp.float32))   # (N, C) f32

    # One gate value per folded row; only this tiny array is cast to the input dtype.
    gate_rows = jnp.repeat(gate.reshape(R), G).astype(dtype)
    if rows_p != rows:
        gate_rows = jnp.pad(gate_rows, (0, rows_p - rows))
    gate_rows = gate_rows.reshape(rows_p, 1)

    # ---- Pass 2: tiled broadcast multiply (one load + one store per element). ----
    out_f = pl.pallas_call(
        _scale_kernel,
        out_shape=jax.ShapeDtypeStruct((rows_p, LS), dtype),
        grid_spec=pltpu.PrefetchScalarGridSpec(
            num_scalar_prefetch=0,
            grid=(n_row_tiles,),
            in_specs=[
                pl.BlockSpec((TR, LS), lambda i: (i, 0)),
                pl.BlockSpec((TR, 1), lambda i: (i, 0)),
            ],
            out_specs=pl.BlockSpec((TR, LS), lambda i: (i, 0)),
        ),
        compiler_params=pltpu.CompilerParams(
            dimension_semantics=("parallel",),
        ),
        input_output_aliases={0: 0} if donate_input else {},
    )(xf, gate_rows)

    out = out_f[:rows].reshape(R, Sp)[:, :S].reshape(N, C, D, H, W)
    return out


def _reference(x, w1, b1, w2, b2):
    xf = x.astype(jnp.float32)
    g = jnp.mean(xf, axis=(2, 3, 4))
    h = jnp.maximum(g @ jnp.asarray(w1, jnp.float32).T + jnp.asarray(b1, jnp.float32), 0.0)
    s = jax.nn.sigmoid(h @ jnp.asarray(w2, jnp.float32).T + jnp.asarray(b2, jnp.float32))
    return (s[:, :, None, None, None] * xf).astype(x.dtype)


if __name__ == "__main__":
    key = jax.random.PRNGKey(0)

    def make_params(k, c):
        k1, k2, k3, k4 = jax.random.split(k, 4)
        w1 = jax.random.normal(k1, (c, c), jnp.float32) * 0.1
        b1 = jax.random.normal(k2, (c,), jnp.float32) * 0.1
        w2 = jax.random.normal(k3, (c, c), jnp.float32) * 0.1
        b2 = jax.random.normal(k4, (c,), jnp.float32) * 0.1
        return w1, b1, w2, b2

    cases = [
        # (shape NCDHW,            dtype,        atol, rtol)
        ((2, 4, 4, 8, 8), jnp.float32, 1e-5, 1e-5),   # lane-dense S = 256
        ((2, 4, 3, 5, 7), jnp.float32, 1e-5, 1e-5),   # S = 105 -> padded to 128 lanes
        ((2, 8, 4, 8, 8), jnp.bfloat16, 2e-2, 3e-2),  # low-precision gate multiply
    ]

    k = key
    for idx, (shape, dtype, atol, rtol) in enumerate(cases):
        k, kp, kd = jax.random.split(k, 3)
        N, C = shape[0], shape[1]
        x = jax.random.normal(kd, shape, jnp.float32).astype(dtype)
        w1, b1, w2, b2 = make_params(kp, C)

        out = jax.block_until_ready(attention_se_ca(x, w1, b1, w2, b2))
        ref = _reference(x, w1, b1, w2, b2)

        assert out.shape == x.shape and out.dtype == x.dtype
        ok = jnp.allclose(out.astype(jnp.float32), ref.astype(jnp.float32),
                          atol=atol, rtol=rtol)
        assert bool(ok), f"case {idx}: mismatch vs pure-JAX reference"

    print("KERNEL_OK")
</pallas_src>

<mosaic_0001>
module attributes {stable_mosaic.version = 11 : i64} {
  func.func @_pool_kernel(%arg0: i32, %arg1: memref<8x256xf32, #tpu.memory_space<vmem>>, %arg2: memref<8x1xf32, #tpu.memory_space<vmem>>) attributes {dimension_semantics = [#tpu.dimension_semantics<parallel>], iteration_bounds = array<i64: 1>, scalar_prefetch = 0 : i64, scratch_operands = 0 : i64, tpu.core_type = #tpu.core_type<tc>, window_params = [{transform_indices = @transform_0, window_bounds = array<i64: 8, 256>}, {transform_indices = @transform_1, window_bounds = array<i64: 8, 1>}]} {
    %c0 = arith.constant 0 : index
    %c0_0 = arith.constant 0 : index
    %0 = vector.load %arg1[%c0, %c0_0] : memref<8x256xf32, #tpu.memory_space<vmem>>, vector<8x256xf32>
    %cst = arith.constant dense<0.000000e+00> : vector<8xf32>
    %1 = vector.multi_reduction <add>, %0, %cst [1] : vector<8x256xf32> to vector<8xf32>
    %2 = vector.shape_cast %1 : vector<8xf32> to vector<8x1xf32>
    %c0_1 = arith.constant 0 : index
    %c0_2 = arith.constant 0 : index
    %3 = vector.load %arg2[%c0_1, %c0_2] : memref<8x1xf32, #tpu.memory_space<vmem>>, vector<8x1xf32>
    tpu.vector_store %arg2[%c0_1, %c0_2], %2 {strides = array<i32>} : memref<8x1xf32, #tpu.memory_space<vmem>>, vector<8x1xf32>,
    return
  }
  func.func @transform_0(%arg0: i32) -> (i32, i32) {
    %c0_i32 = arith.constant 0 : i32
    %c0_i32_0 = arith.constant 0 : i32
    return %arg0, %c0_i32 : i32, i32
  }
  func.func @transform_1(%arg0: i32) -> (i32, i32) {
    %c0_i32 = arith.constant 0 : i32
    %c0_i32_0 = arith.constant 0 : i32
    return %arg0, %c0_i32 : i32, i32
  }
}

</mosaic_0001>

<bundles_post_ra>
// kernel: tpu_custom_call.1
= control target key start
LH: loop header
LB: loop body
LE: loop exit
PB: predicated region body
PF: predicated region fallthrough
CT: control target
= control target key end

     0   :  { %6 = vsyncpa [#allocation3], 0  ;;  %s55_s6 = smov [#allocation2]   ;;  %s72_s0 = inlined_call_operand.hbm [shape: f32[8,256], index: 0, kind: input, shape index: {}]   ;;  %s73_s1 = inlined_call_operand.vmem [shape: f32[8,1], index: 1, kind: output, shape index: {}]  }
   0x1   :  { %s13_s7 = sshll.u32 %s55_s6, 4  ;;  %s14_s7 = int_to_ptr.vmem [resolvable:$true] %s13_s7 }
   0x2   :  { %s41_s8 = scalar_lea.vmem %s14_s7, 256  ;;  %p46_p1 = scmp.lt.s32.totalorder %s14_s7, %s14_s7 }
   0x3   :  { %p42_p0 = scmp.ne.s32.totalorder %s14_s7, %s41_s8  ;;  %p47_p2 = scmp.lt.s32.totalorder %s41_s8, %s41_s8 }
   0x5   :  { %p48_p3 = por %p47_p2, %p46_p1 }
   0x7   :  { %p49_p4 = pnand %p48_p3, %p42_p0 }
   0x9   :  { %52 = shalt.err (!%p49_p4)
}
   0xa   :  { %16 = dma.hbm_to_vmem [thread:$0]  %s72_s0, 256, %s14_s7, [#allocation3]  }
   0xb   :  { %53 = dma.done.wait [#allocation3], 256  }
   0xc   :  { %54 = vsyncadd [#allocation3], 4294967040  ;;  %v20_v0 = vld [vmem:[#allocation2] sm:$0xff]  ;;  %v21_v1 = vld [vmem:[#allocation2 + $0x8] sm:$0xff]  ;;  %vm25_vm0 = vcmask 7168  }
   0xd   :  { %v22_v2 = vadd.f32 %v21_v1, %v20_v0 }
   0xf   :  { %23 = vadd.xlane.f32.xlu0 %v22_v2 }
  0x98   :  { %v24_v3 = vpop.xlane.xlu0 %23 }
  0x99   :  { %26 = vst.msk [vmem:[%s73_s1] sm:$0xff] %vm25_vm0, %v24_v3 }
  0x9a   :  { %31 = vsyncpa [#allocation3], 1 }

</bundles_post_ra>
